<compile_context>
chip_gen: v7x
topology: tpu7x:2x2x1
jax: 0.10.0
libtpu: 0.0.40
codegen_flags: <defaults>
</compile_context>

<pallas_src>
import functools

import jax
import jax.numpy as jnp
from jax.experimental import pallas as pl
from jax.experimental.pallas import tpu as pltpu


def _round_up(n, m):
    return ((n + m - 1) // m) * m


def _qnet_kernel(x_ref, w1_ref, b1_ref, w2_ref, b2_ref, w3_ref, b3_ref, o_ref):
    # Fully fused 3-layer MLP on one batch tile.  MXU matmuls accumulate in f32,
    # bias-add / ReLU run on the VPU, final store is a full-lane (128-wide) vst.
    x = x_ref[...]
    h1 = jnp.dot(x, w1_ref[...], preferred_element_type=jnp.float32) + b1_ref[...]
    h1 = jnp.maximum(h1, 0.0)
    h2 = jnp.dot(h1, w2_ref[...], preferred_element_type=jnp.float32) + b2_ref[...]
    h2 = jnp.maximum(h2, 0.0)
    out = jnp.dot(h2, w3_ref[...], preferred_element_type=jnp.float32) + b3_ref[...]
    o_ref[...] = out.astype(o_ref.dtype)


@functools.partial(jax.jit, static_argnames=("block_batch",))
def linear_qnet_forward(x, params, *, block_batch=256):
    """x: (B, input_size) f32. params: dict of w1,b1,w2,b2,w3,b3 (weights stored (in, out))."""
    w1, b1 = params["w1"], params["b1"]
    w2, b2 = params["w2"], params["b2"]
    w3, b3 = params["w3"], params["b3"]

    B, in_f = x.shape
    h1f = w1.shape[1]
    h2f = w2.shape[1]
    out_f = w3.shape[1]

    # --- Lane-dense output: pad the final layer's output dim to a multiple of 128 so the
    #     kernel's store is unmasked; extra columns are zero and sliced off afterwards.
    out_pad = _round_up(out_f, 128)
    if out_pad != out_f:
        w3 = jnp.pad(w3, ((0, 0), (0, out_pad - out_f)))
        b3 = jnp.pad(b3, ((0, 0), (0, out_pad - out_f)))

    # --- Batch tiling: tile is a multiple of the f32 sublane (8), capped at block_batch.
    tb = min(block_batch, _round_up(B, 8))
    b_pad = _round_up(B, tb)
    if b_pad != B:
        x = jnp.pad(x, ((0, b_pad - B), (0, 0)))
    grid = (b_pad // tb,)

    # Advisory cost estimate (true flops / bytes — this kernel is dispatch-bound).
    flops = 2 * b_pad * (in_f * h1f + h1f * h2f + h2f * out_pad)
    bytes_accessed = 4 * (
        b_pad * in_f                       # x stream in
        + in_f * h1f + h1f                 # layer 1 params
        + h1f * h2f + h2f                  # layer 2 params
        + h2f * out_pad + out_pad          # layer 3 params (padded)
        + b_pad * out_pad                  # out stream
    )

    def resident(shape):
        # Constant block index across the batch grid -> DMA'd once, stays in VMEM.
        return pl.BlockSpec(shape, lambda i: (0, 0))

    out = pl.pallas_call(
        _qnet_kernel,
        out_shape=jax.ShapeDtypeStruct((b_pad, out_pad), jnp.float32),
        grid=grid,
        in_specs=[
            pl.BlockSpec((tb, in_f), lambda i: (i, 0)),  # x: streams over batch tiles
            resident(w1.shape), resident(b1.shape),
            resident(w2.shape), resident(b2.shape),
            resident(w3.shape), resident(b3.shape),
        ],
        out_specs=pl.BlockSpec((tb, out_pad), lambda i: (i, 0)),
        compiler_params=pltpu.CompilerParams(
            dimension_semantics=("parallel",),           # megacore / v7x 2nd TC
        ),
        cost_estimate=pl.CostEstimate(
            flops=flops, transcendentals=0, bytes_accessed=bytes_accessed
        ),
    )(x, w1, b1, w2, b2, w3, b3)

    return out[:B, :out_f]


def init_params(key, input_size, hidden1, hidden2, output_size):
    """Deterministic init mirroring nn.Linear default: U(-1/sqrt(fan_in), 1/sqrt(fan_in))."""
    ks = jax.random.split(key, 6)

    def layer(kw, kb, fan_in, fan_out):
        bound = 1.0 / (fan_in ** 0.5)
        # Stored as (in, out): transpose of PyTorch's (out, in) weight.
        w = jax.random.uniform(kw, (fan_in, fan_out), jnp.float32, -bound, bound)
        b = jax.random.uniform(kb, (1, fan_out), jnp.float32, -bound, bound)
        return w, b

    w1, b1 = layer(ks[0], ks[1], input_size, hidden1)
    w2, b2 = layer(ks[2], ks[3], hidden1, hidden2)
    w3, b3 = layer(ks[4], ks[5], hidden2, output_size)
    return {"w1": w1, "b1": b1, "w2": w2, "b2": b2, "w3": w3, "b3": b3}


def reference_forward(x, p):
    h1 = jnp.maximum(x @ p["w1"] + p["b1"], 0.0)
    h2 = jnp.maximum(h1 @ p["w2"] + p["b2"], 0.0)
    return h2 @ p["w3"] + p["b3"]


if __name__ == "__main__":
    # Snake Q-net sizes: 11 state features, two hidden layers of 32, 3 actions.
    input_size, hidden1, hidden2, output_size = 11, 32, 32, 3

    key = jax.random.PRNGKey(0)
    k_x, k_p, k_xl = jax.random.split(key, 3)
    params = init_params(k_p, input_size, hidden1, hidden2, output_size)

    # Small single-step batch (as in inference during play).
    x_small = jax.random.normal(k_x, (2, input_size), jnp.float32)
    out_small = jax.block_until_ready(linear_qnet_forward(x_small, params))
    ref_small = reference_forward(x_small, params)
    assert out_small.shape == (2, output_size)
    assert jnp.allclose(out_small, ref_small, atol=1e-5, rtol=1e-5), "small-batch mismatch"

    # Replay-buffer-style minibatch to exercise the batch grid (multiple tiles).
    x_big = jax.random.normal(k_xl, (512, input_size), jnp.float32)
    out_big = jax.block_until_ready(linear_qnet_forward(x_big, params, block_batch=256))
    ref_big = reference_forward(x_big, params)
    assert out_big.shape == (512, output_size)
    assert jnp.allclose(out_big, ref_big, atol=1e-5, rtol=1e-5), "minibatch mismatch"

    print("KERNEL_OK")
</pallas_src>

<mosaic_0001>
module attributes {stable_mosaic.version = 11 : i64} {
  func.func @_qnet_kernel(%arg0: i32, %arg1: memref<8x11xf32, #tpu.memory_space<vmem>>, %arg2: memref<11x32xf32, #tpu.memory_space<vmem>>, %arg3: memref<1x32xf32, #tpu.memory_space<vmem>>, %arg4: memref<32x32xf32, #tpu.memory_space<vmem>>, %arg5: memref<1x32xf32, #tpu.memory_space<vmem>>, %arg6: memref<32x128xf32, #tpu.memory_space<vmem>>, %arg7: memref<1x128xf32, #tpu.memory_space<vmem>>, %arg8: memref<8x128xf32, #tpu.memory_space<vmem>>) attributes {dimension_semantics = [#tpu.dimension_semantics<parallel>], iteration_bounds = array<i64: 1>, scalar_prefetch = 0 : i64, scratch_operands = 0 : i64, tpu.core_type = #tpu.core_type<tc>, window_params = [{transform_indices = @transform_0, window_bounds = array<i64: 8, 11>}, {pipeline_mode = #tpu.pipeline_mode<synchronous>, transform_indices = @transform_1, window_bounds = array<i64: 11, 32>}, {pipeline_mode = #tpu.pipeline_mode<synchronous>, transform_indices = @transform_2, window_bounds = array<i64: 1, 32>}, {pipeline_mode = #tpu.pipeline_mode<synchronous>, transform_indices = @transform_3, window_bounds = array<i64: 32, 32>}, {pipeline_mode = #tpu.pipeline_mode<synchronous>, transform_indices = @transform_4, window_bounds = array<i64: 1, 32>}, {pipeline_mode = #tpu.pipeline_mode<synchronous>, transform_indices = @transform_5, window_bounds = array<i64: 32, 128>}, {pipeline_mode = #tpu.pipeline_mode<synchronous>, transform_indices = @transform_6, window_bounds = array<i64: 1, 128>}, {transform_indices = @transform_7, window_bounds = array<i64: 8, 128>}]} {
    %c0 = arith.constant 0 : index
    %c0_0 = arith.constant 0 : index
    %0 = vector.load %arg1[%c0, %c0_0] : memref<8x11xf32, #tpu.memory_space<vmem>>, vector<8x11xf32>
    %c0_1 = arith.constant 0 : index
    %c0_2 = arith.constant 0 : index
    %1 = vector.load %arg2[%c0_1, %c0_2] : memref<11x32xf32, #tpu.memory_space<vmem>>, vector<11x32xf32>
    %cst = arith.constant dense<0.000000e+00> : vector<8x32xf32>
    %2 = tpu.matmul %0, %1, %cst {dimension_numbers = #tpu.dot_dimension_numbers<[1], [0], [0], [1], [0, 0, 1, 1], [], []>} : vector<8x11xf32>, vector<11x32xf32>, vector<8x32xf32> -> vector<8x32xf32>
    %c0_3 = arith.constant 0 : index
    %c0_4 = arith.constant 0 : index
    %3 = vector.load %arg3[%c0_3, %c0_4] : memref<1x32xf32, #tpu.memory_space<vmem>>, vector<1x32xf32>
    %4 = vector.broadcast %3 : vector<1x32xf32> to vector<8x32xf32>
    %5 = arith.addf %2, %4 : vector<8x32xf32>
    %cst_5 = arith.constant 0.000000e+00 : f32
    %6 = vector.broadcast %cst_5 : f32 to vector<8x32xf32>
    %7 = arith.maximumf %5, %6 : vector<8x32xf32>
    %c0_6 = arith.constant 0 : index
    %c0_7 = arith.constant 0 : index
    %8 = vector.load %arg4[%c0_6, %c0_7] : memref<32x32xf32, #tpu.memory_space<vmem>>, vector<32x32xf32>
    %cst_8 = arith.constant dense<0.000000e+00> : vector<8x32xf32>
    %9 = tpu.matmul %7, %8, %cst_8 {dimension_numbers = #tpu.dot_dimension_numbers<[1], [0], [0], [1], [0, 0, 1, 1], [], []>} : vector<8x32xf32>, vector<32x32xf32>, vector<8x32xf32> -> vector<8x32xf32>
    %c0_9 = arith.constant 0 : index
    %c0_10 = arith.constant 0 : index
    %10 = vector.load %arg5[%c0_9, %c0_10] : memref<1x32xf32, #tpu.memory_space<vmem>>, vector<1x32xf32>
    %11 = vector.broadcast %10 : vector<1x32xf32> to vector<8x32xf32>
    %12 = arith.addf %9, %11 : vector<8x32xf32>
    %cst_11 = arith.constant 0.000000e+00 : f32
    %13 = vector.broadcast %cst_11 : f32 to vector<8x32xf32>
    %14 = arith.maximumf %12, %13 : vector<8x32xf32>
    %c0_12 = arith.constant 0 : index
    %c0_13 = arith.constant 0 : index
    %15 = vector.load %arg6[%c0_12, %c0_13] : memref<32x128xf32, #tpu.memory_space<vmem>>, vector<32x128xf32>
    %cst_14 = arith.constant dense<0.000000e+00> : vector<8x128xf32>
    %16 = tpu.matmul %14, %15, %cst_14 {dimension_numbers = #tpu.dot_dimension_numbers<[1], [0], [0], [1], [0, 0, 1, 1], [], []>} : vector<8x32xf32>, vector<32x128xf32>, vector<8x128xf32> -> vector<8x128xf32>
    %c0_15 = arith.constant 0 : index
    %c0_16 = arith.constant 0 : index
    %17 = vector.load %arg7[%c0_15, %c0_16] : memref<1x128xf32, #tpu.memory_space<vmem>>, vector<1x128xf32>
    %18 = vector.broadcast %17 : vector<1x128xf32> to vector<8x128xf32>
    %19 = arith.addf %16, %18 : vector<8x128xf32>
    %c0_17 = arith.constant 0 : index
    %c0_18 = arith.constant 0 : index
    %20 = vector.load %arg8[%c0_17, %c0_18] : memref<8x128xf32, #tpu.memory_space<vmem>>, vector<8x128xf32>
    tpu.vector_store %arg8[%c0_17, %c0_18], %19 {strides = array<i32>} : memref<8x128xf32, #tpu.memory_space<vmem>>, vector<8x128xf32>,
    return
  }
  func.func @transform_0(%arg0: i32) -> (i32, i32) {
    %c0_i32 = arith.constant 0 : i32
    %c0_i32_0 = arith.constant 0 : i32
    return %arg0, %c0_i32 : i32, i32
  }
  func.func @transform_1(%arg0: i32) -> (i32, i32) {
    %c0_i32 = arith.constant 0 : i32
    %c0_i32_0 = arith.constant 0 : i32
    %c0_i32_1 = arith.constant 0 : i32
    return %c0_i32, %c0_i32_0 : i32, i32
  }
  func.func @transform_2(%arg0: i32) -> (i32, i32) {
    %c0_i32 = arith.constant 0 : i32
    %c0_i32_0 = arith.constant 0 : i32
    %c0_i32_1 = arith.constant 0 : i32
    return %c0_i32, %c0_i32_0 : i32, i32
  }
  func.func @transform_3(%arg0: i32) -> (i32, i32) {
    %c0_i32 = arith.constant 0 : i32
    %c0_i32_0 = arith.constant 0 : i32
    %c0_i32_1 = arith.constant 0 : i32
    return %c0_i32, %c0_i32_0 : i32, i32
  }
  func.func @transform_4(%arg0: i32) -> (i32, i32) {
    %c0_i32 = arith.constant 0 : i32
    %c0_i32_0 = arith.constant 0 : i32
    %c0_i32_1 = arith.constant 0 : i32
    return %c0_i32, %c0_i32_0 : i32, i32
  }
  func.func @transform_5(%arg0: i32) -> (i32, i32) {
    %c0_i32 = arith.constant 0 : i32
    %c0_i32_0 = arith.constant 0 : i32
    %c0_i32_1 = arith.constant 0 : i32
    return %c0_i32, %c0_i32_0 : i32, i32
  }
  func.func @transform_6(%arg0: i32) -> (i32, i32) {
    %c0_i32 = arith.constant 0 : i32
    %c0_i32_0 = arith.constant 0 : i32
    %c0_i32_1 = arith.constant 0 : i32
    return %c0_i32, %c0_i32_0 : i32, i32
  }
  func.func @transform_7(%arg0: i32) -> (i32, i32) {
    %c0_i32 = arith.constant 0 : i32
    %c0_i32_0 = arith.constant 0 : i32
    return %arg0, %c0_i32 : i32, i32
  }
}

</mosaic_0001>

<bundles_post_ra>
// kernel: linear_qnet_forward.1
= control target key start
LH: loop header
LB: loop body
LE: loop exit
PB: predicated region body
PF: predicated region fallthrough
CT: control target
= control target key end

     0   :  { %vm40_vm0 = vcmask 1042432   ;;  %v359_v0 = vmov 0.0|0.0   ;;  %vm360_vm1 = vmmov 1   ;;  %vm361_vm3 = vmmov 0   ;;  %s448_s1 = inlined_call_operand.vmem [shape: f32[11,32], index: 1, kind: input, shape index: {}]   ;;  %s449_s3 = inlined_call_operand.vmem [shape: f32[32,32], index: 3, kind: input, shape index: {}]   ;;  %s450_s0 = inlined_call_operand.vmem [shape: f32[8,11], index: 0, kind: input, shape index: {}]   ;;  %s451_s5 = inlined_call_operand.vmem [shape: f32[32,128], index: 5, kind: input, shape index: {}]   ;;  %s452_s2 = inlined_call_operand.vmem [shape: f32[1,32], index: 2, kind: input, shape index: {}]   ;;  %s453_s4 = inlined_call_operand.vmem [shape: f32[1,32], index: 4, kind: input, shape index: {}]   ;;  %s454_s6 = inlined_call_operand.vmem [shape: f32[1,128], index: 6, kind: input, shape index: {}]   ;;  %s455_s7 = inlined_call_operand.vmem [shape: f32[8,128], index: 7, kind: output, shape index: {}]  }
   0x1   :  { %339 = vmatprep.subr.bf16.mxu0 %v359_v0  ;;  %v27_v1 = vld [vmem:[%s448_s1] sm:$0xff]  ;;  %v28_v2 = vld [vmem:[%s448_s1 + $0x8] sm:$0x7]  ;;  %vm341_vm2 = vmpackc.low %vm40_vm0, %vm360_vm1  ;;  %343 = vmatprep.subr.bf16.mxu1 %v359_v0  ;;  %v362_v4 = vmov 0.0   ;;  %vm36_vm4 = vcmask 89088   ;;  %vm126_vm5 = vcmask 261120  }
   0x2   :  { %v340_v3 = vpack.c.bf16 %v28_v2, %v27_v1  ;;  %314 = vmatprep.mubr.msk.f32.mxu0 %vm361_vm3, %v362_v4  ;;  %v115_v5 = vld [vmem:[%s449_s3] sm:$0xff]  ;;  %v116_v6 = vld [vmem:[%s449_s3 + $0x8] sm:$0xff]  ;;  %325 = vmatprep.mubr.msk.f32.mxu1 %vm361_vm3, %v362_v4  ;;  %v117_v9 = vld [vmem:[%s449_s3 + $0x10] sm:$0xff] }
   0x3   :  { %v344_v7 = vpack.c.bf16 %v116_v6, %v115_v5  ;;  %v26_v8 = vld [vmem:[%s450_s0] sm:$0xff]  ;;  %v118_v10 = vld [vmem:[%s449_s3 + $0x18] sm:$0xff]  ;;  %v202_v13 = vld [vmem:[%s451_s5 + $0x8] sm:$0xff] }
   0x4   :  { %342 = vmatpush3.bf16.msk.msra.mxu0 %vm341_vm2, %v340_v3  ;;  %v347_v11 = vpack.c.bf16 %v118_v10, %v117_v9  ;;  %v201_v12 = vld [vmem:[%s451_s5] sm:$0xff]  ;;  %v203_v20 = vld [vmem:[%s451_s5 + $0x10] sm:$0xff]  ;;  %v204_v21 = vld [vmem:[%s451_s5 + $0x18] sm:$0xff] }
   0x5   :  { %345 = vmatpush3.bf16.msra.mxu1 %v344_v7  ;;  %349 = vmatprep.subr.bf16.mxu0 %v359_v0  ;;  %v350_v14 = vpack.c.bf16 %v202_v13, %v201_v12  ;;  %v290_v15 = vld [vmem:[%s452_s2] ss:$0 sm:$0xff]  ;;  %v353_v22 = vpack.c.bf16 %v204_v21, %v203_v20 }
   0x6   :  { %346 = vmatprep.subr.bf16.mxu1 %v359_v0  ;;  %v293_v23 = vld [vmem:[%s453_s4] ss:$0 sm:$0xff] }
   0x7   :  { %315 = vmatmul.mubr.msk.f32.vlgmr.msra.gmra.mrb[0].mxu0 %vm36_vm4, %v26_v8  ;;  %v295_v28 = vld [vmem:[%s454_s6] ss:$0 sm:$0xff] }
   0x8   :  { %336 = vmatprep.mubr.msk.f32.mxu0 %vm361_vm3, %v362_v4  ;;  %351 = vmatpush3.bf16.msra.mxu0 %v350_v14 }
   0x9   :  { %348 = vmatpush3.bf16.msra.mxu1 %v347_v11  ;;  %352 = vmatprep.subr.bf16.mxu0 %v359_v0 }
   0xc   :  { %354 = vmatpush3.bf16.msra.mxu0 %v353_v22 }
  0xda   :  { %v110_v16 = vpop.f32.mrb[0].mxu0 }
  0xdb   :  { %v111_v17 = vadd.f32 %v290_v15, %v110_v16  ;;  %v316_v18 = vpop.f32.mrb[1].mxu0 }
  0xdd   :  { %v114_v19 = vmax.f32 %v111_v17, 0.0 }
  0xdf   :  { %326 = vmatmul.mubr.msk.f32.vlgmr.msra.gmra.mrb[0].mxu1 %vm126_vm5, %v114_v19 }
 0x1b2   :  { %v196_v24 = vpop.f32.mrb[0].mxu1 }
 0x1b3   :  { %v197_v25 = vadd.f32 %v293_v23, %v196_v24  ;;  %v327_v26 = vpop.f32.mrb[1].mxu1 }
 0x1b5   :  { %v200_v27 = vmax.f32 %v197_v25, 0.0 }
 0x1b7   :  { %337 = vmatmul.mubr.msk.f32.vlgmr.msra.gmra.mrb[2].mxu0 %vm126_vm5, %v200_v27 }
 0x28a   :  { %v281_v29 = vpop.f32.mrb[2].mxu0 }
 0x28b   :  { %v282_v30 = vadd.f32 %v295_v28, %v281_v29  ;;  %v338_v31 = vpop.f32.mrb[3].mxu0 }
 0x28d   :  { %285 = vst [vmem:[%s455_s7] sm:$0xff] %v282_v30 }

</bundles_post_ra>
